<compile_context>
chip_gen: v6e
topology: v6e:2x2x1
jax: 0.10.0
libtpu: 0.0.40
codegen_flags: <defaults>
</compile_context>

<pallas_src>
import jax
import jax.numpy as jnp
from jax.experimental import pallas as pl
from jax.experimental.pallas import tpu as pltpu

LANE = 128
SUBLANE = 8


def _round_up(x, m):
    return (x + m - 1) // m * m


def _has_megacore():
    """True on chips with >1 TensorCore per chip (v4 / v5p / v7x)."""
    try:
        kind = jax.devices()[0].device_kind.lower()
    except Exception:
        return False
    if "lite" in kind or "v5e" in kind or "v6" in kind:
        return False
    return any(t in kind for t in ("v4", "v5p", "v7"))


# --------------------------------------------------------------------------- kernels
def _mlp1_resident_kernel(x_ref, w1_ref, b1_ref, w2_ref, b2_ref, o_ref):
    # Both weights VMEM-resident.  f32 accumulation + f32 bias/ReLU epilogue.
    x = x_ref[...].astype(w1_ref.dtype)                      # in-kernel cast: no extra HBM pass
    h = jnp.dot(x, w1_ref[...], preferred_element_type=jnp.float32)
    h = jnp.maximum(h + b1_ref[...], 0.0)
    y = jnp.dot(h.astype(w2_ref.dtype), w2_ref[...],
                preferred_element_type=jnp.float32)
    o_ref[...] = jnp.maximum(y + b2_ref[...], 0.0).astype(o_ref.dtype)


def _mlp1_htiled_kernel(x_ref, w1_ref, b1_ref, w2_ref, b2_ref, o_ref, acc_ref):
    # Hidden dim tiled as a trailing "arbitrary" reduction axis (large num_hidden).
    h_idx = pl.program_id(1)

    @pl.when(h_idx == 0)
    def _():
        acc_ref[...] = jnp.zeros_like(acc_ref)

    x = x_ref[...].astype(w1_ref.dtype)
    h = jnp.dot(x, w1_ref[...], preferred_element_type=jnp.float32)
    h = jnp.maximum(h + b1_ref[...], 0.0)
    acc_ref[...] += jnp.dot(h.astype(w2_ref.dtype), w2_ref[...],
                            preferred_element_type=jnp.float32)

    @pl.when(h_idx == pl.num_programs(1) - 1)
    def _():
        o_ref[...] = jnp.maximum(acc_ref[...] + b2_ref[...], 0.0).astype(o_ref.dtype)


# ------------------------------------------------------------------- param prep (once)
def prepare_mlp1_params(w1, b1, w2, b2, *, compute_dtype=jnp.bfloat16):
    """Pad (hidden/class dims to lane multiples) and cast the parameters once.

    w1: (num_input, num_hidden)   b1: (num_hidden,) or (1, num_hidden)
    w2: (num_hidden, num_class)   b2: (num_class,)  or (1, num_class)
    compute_dtype: MXU input dtype (bf16 default; accumulation and the bias/ReLU
      epilogue stay float32).  Pass jnp.float32 for exact f32 semantics.
    """
    num_input, num_hidden = w1.shape
    num_class = w2.shape[1]
    Hp = _round_up(num_hidden, LANE)
    Cp = _round_up(num_class, LANE)

    wdt = jnp.dtype(compute_dtype) if compute_dtype is not None else jnp.asarray(w1).dtype
    w1p = jnp.pad(jnp.asarray(w1, wdt), ((0, 0), (0, Hp - num_hidden)))
    w2p = jnp.pad(jnp.asarray(w2, wdt), ((0, Hp - num_hidden), (0, Cp - num_class)))
    b1p = jnp.pad(jnp.asarray(b1, jnp.float32).reshape(1, num_hidden),
                  ((0, 0), (0, Hp - num_hidden)))
    b2p = jnp.pad(jnp.asarray(b2, jnp.float32).reshape(1, num_class),
                  ((0, 0), (0, Cp - num_class)))
    return dict(w1=w1p, b1=b1p, w2=w2p, b2=b2p,
                num_input=num_input, num_hidden=num_hidden, num_class=num_class)


# ------------------------------------------------------------------------- forward
def mlp1_forward(x, params, *, batch_tile=512, hidden_tile=512,
                 max_resident_weight_bytes=8 << 20,
                 out_dtype=None, return_padded=False):
    """x: (..., num_input); params: output of prepare_mlp1_params()."""
    w1, b1, w2, b2 = params["w1"], params["b1"], params["w2"], params["b2"]
    num_input, num_class = params["num_input"], params["num_class"]
    Hp, Cp = w1.shape[1], w2.shape[1]

    lead_shape = x.shape[:-1]
    x = x.reshape(-1, x.shape[-1])
    B, K = x.shape
    assert K == num_input, (K, num_input)
    out_dtype = x.dtype if out_dtype is None else jnp.dtype(out_dtype)

    # ---- batch tile --------------------------------------------------------
    tb = max(SUBLANE, min(batch_tile, _round_up(B, SUBLANE)))
    tb = _round_up(tb, SUBLANE)
    # Only split the batch for megacore chips (v4/v5p/v7x): on single-TC chips a
    # split just adds per-step overhead and halves the MXU M-dim fill.
    if _has_megacore() and B >= 2 * SUBLANE and _round_up(B, tb) // tb < 2:
        tb = _round_up(pl.cdiv(B, 2), SUBLANE)
    Bp = _round_up(B, tb)
    if Bp != B:                                 # row pad only when B % tb != 0
        x = jnp.pad(x, ((0, Bp - B), (0, 0)))

    # ---- resident vs hidden-tiled weight strategy --------------------------
    w_item = jnp.dtype(w1.dtype).itemsize
    weight_bytes = (num_input * Hp + Hp * Cp) * w_item
    tiled = weight_bytes > max_resident_weight_bytes
    if tiled:
        n_lanes = Hp // LANE
        t = max(1, min(hidden_tile // LANE, n_lanes))
        while n_lanes % t:                      # th must divide Hp exactly
            t -= 1
        th = t * LANE
    else:
        th = Hp
    n_h = Hp // th

    flops = int(2 * Bp * (num_input * Hp + Hp * Cp))
    bytes_accessed = int(
        x.size * x.dtype.itemsize
        + w1.size * w_item + w2.size * w_item
        + b1.size * 4 + b2.size * 4
        + Bp * Cp * jnp.dtype(out_dtype).itemsize)

    def run(single_buffer):
        inv = dict(pipeline_mode=pl.Buffered(1)) if single_buffer else {}
        if not tiled:
            grid = (Bp // tb,)
            in_specs = [
                pl.BlockSpec((tb, num_input), lambda i: (i, 0)),          # x tile (K unpadded)
                pl.BlockSpec((num_input, Hp), lambda i: (0, 0), **inv),   # W1 (resident)
                pl.BlockSpec((1, Hp), lambda i: (0, 0), **inv),           # b1
                pl.BlockSpec((Hp, Cp), lambda i: (0, 0), **inv),          # W2 (resident)
                pl.BlockSpec((1, Cp), lambda i: (0, 0), **inv),           # b2
            ]
            out_specs = pl.BlockSpec((tb, Cp), lambda i: (i, 0))          # lane-dense store
            scratch = []
            kernel = _mlp1_resident_kernel
            dims = ("parallel",)
        else:
            grid = (Bp // tb, n_h)
            in_specs = [
                pl.BlockSpec((tb, num_input), lambda i, h: (i, 0)),
                pl.BlockSpec((num_input, th), lambda i, h: (0, h)),
                pl.BlockSpec((1, th), lambda i, h: (0, h)),
                pl.BlockSpec((th, Cp), lambda i, h: (h, 0)),
                pl.BlockSpec((1, Cp), lambda i, h: (0, 0), **inv),
            ]
            out_specs = pl.BlockSpec((tb, Cp), lambda i, h: (i, 0))
            scratch = [pltpu.VMEM((tb, Cp), jnp.float32)]
            kernel = _mlp1_htiled_kernel
            dims = ("parallel", "arbitrary")

        # Explicit VMEM budget (v5e scoped default is only 16 MiB; v7x physical is 64 MiB).
        w_bufs = 1 if (single_buffer and not tiled) else 2
        vmem_est = (
            2 * tb * num_input * x.dtype.itemsize                 # x tiles (double buffered)
            + 2 * tb * Cp * jnp.dtype(out_dtype).itemsize         # out tiles
            + w_bufs * (num_input * th + th * Cp) * w_item        # weights
            + w_bufs * (Hp + Cp) * 4                              # biases (f32)
            + (tb * Cp * 4 if tiled else 0))                      # accumulator
        vmem_limit = int(min(100 << 20, max(2 * vmem_est + (4 << 20), 16 << 20)))

        return pl.pallas_call(
            kernel,
            out_shape=jax.ShapeDtypeStruct((Bp, Cp), out_dtype),
            grid_spec=pltpu.PrefetchScalarGridSpec(
                num_scalar_prefetch=0,
                grid=grid,
                in_specs=in_specs,
                out_specs=out_specs,
                scratch_shapes=scratch),
            compiler_params=pltpu.CompilerParams(
                dimension_semantics=dims,
                vmem_limit_bytes=vmem_limit),
            cost_estimate=pl.CostEstimate(
                flops=flops, transcendentals=0, bytes_accessed=bytes_accessed),
        )(x, w1, b1, w2, b2)

    try:
        out = run(single_buffer=True)
    except Exception:
        # pl.Buffered(1) not supported by this jax/Mosaic build -> default buffering.
        out = run(single_buffer=False)

    if return_padded:
        return out                              # (Bp, Cp): let the consumer fuse the slice
    out = out[:B, :num_class]
    return out.reshape(*lead_shape, num_class)


def mlp1_reference(x, w1, b1, w2, b2):
    h = jnp.maximum(x @ w1 + b1.reshape(1, -1), 0.0)
    return jnp.maximum(h @ w2 + b2.reshape(1, -1), 0.0)


if __name__ == "__main__":
    key = jax.random.PRNGKey(0)
    kx, kw1, kb1, kw2, kb2 = jax.random.split(key, 5)

    # Small shapes consistent with MLP1(num_input=64, num_hidden=32, num_class=32).
    batch, num_input, num_hidden, num_class = 16, 64, 32, 32
    x = jax.random.normal(kx, (batch, num_input), dtype=jnp.float32)

    bound1 = 1.0 / num_input ** 0.5
    w1 = jax.random.uniform(kw1, (num_input, num_hidden), jnp.float32, -bound1, bound1)
    b1 = jax.random.uniform(kb1, (num_hidden,), jnp.float32, -bound1, bound1)
    bound2 = 1.0 / num_hidden ** 0.5
    w2 = jax.random.uniform(kw2, (num_hidden, num_class), jnp.float32, -bound2, bound2)
    b2 = jax.random.uniform(kb2, (num_class,), jnp.float32, -bound2, bound2)

    ref = mlp1_reference(x, w1, b1, w2, b2)

    # 1) exact f32 path (same numerics as the PyTorch module).
    p_f32 = prepare_mlp1_params(w1, b1, w2, b2, compute_dtype=jnp.float32)
    out = jax.block_until_ready(mlp1_forward(x, p_f32))
    assert out.shape == (batch, num_class)
    assert jnp.allclose(out, ref, atol=1e-4, rtol=1e-4)

    # 2) default bf16-MXU path (f32 accumulation + f32 bias/ReLU epilogue).
    p_bf16 = prepare_mlp1_params(w1, b1, w2, b2)
    out_bf16 = jax.block_until_ready(mlp1_forward(x, p_bf16))
    assert out_bf16.shape == (batch, num_class)
    assert jnp.allclose(out_bf16, ref, atol=5e-2, rtol=5e-2)

    # 3) hidden-tiled fallback (forced here), used automatically when the weights are
    #    too large to stay VMEM-resident (e.g. big num_hidden on v7x's 64 MiB VMEM).
    num_hidden_big = 384
    w1b = jax.random.uniform(kw1, (num_input, num_hidden_big), jnp.float32, -bound1, bound1)
    b1b = jax.random.uniform(kb1, (num_hidden_big,), jnp.float32, -bound1, bound1)
    bound2b = 1.0 / num_hidden_big ** 0.5
    w2b = jax.random.uniform(kw2, (num_hidden_big, num_class), jnp.float32, -bound2b, bound2b)
    b2b = jax.random.uniform(kb2, (num_class,), jnp.float32, -bound2b, bound2b)
    refb = mlp1_reference(x, w1b, b1b, w2b, b2b)
    p_big = prepare_mlp1_params(w1b, b1b, w2b, b2b, compute_dtype=jnp.float32)
    out_big = jax.block_until_ready(
        mlp1_forward(x, p_big, hidden_tile=128, max_resident_weight_bytes=0))
    assert out_big.shape == (batch, num_class)
    assert jnp.allclose(out_big, refb, atol=1e-4, rtol=1e-4)

    print("KERNEL_OK")
</pallas_src>

<mosaic_0001>
module attributes {stable_mosaic.version = 11 : i64} {
  func.func @_mlp1_resident_kernel(%arg0: i32, %arg1: memref<16x64xf32, #tpu.memory_space<vmem>>, %arg2: memref<64x128xf32, #tpu.memory_space<vmem>>, %arg3: memref<1x128xf32, #tpu.memory_space<vmem>>, %arg4: memref<128x128xf32, #tpu.memory_space<vmem>>, %arg5: memref<1x128xf32, #tpu.memory_space<vmem>>, %arg6: memref<16x128xf32, #tpu.memory_space<vmem>>) attributes {dimension_semantics = [#tpu.dimension_semantics<parallel>], iteration_bounds = array<i64: 1>, scalar_prefetch = 0 : i64, scratch_operands = 0 : i64, tpu.core_type = #tpu.core_type<tc>, window_params = [{transform_indices = @transform_0, window_bounds = array<i64: 16, 64>}, {pipeline_mode = #tpu.pipeline_mode<synchronous>, transform_indices = @transform_1, window_bounds = array<i64: 64, 128>}, {pipeline_mode = #tpu.pipeline_mode<synchronous>, transform_indices = @transform_2, window_bounds = array<i64: 1, 128>}, {pipeline_mode = #tpu.pipeline_mode<synchronous>, transform_indices = @transform_3, window_bounds = array<i64: 128, 128>}, {pipeline_mode = #tpu.pipeline_mode<synchronous>, transform_indices = @transform_4, window_bounds = array<i64: 1, 128>}, {transform_indices = @transform_5, window_bounds = array<i64: 16, 128>}]} {
    %c0 = arith.constant 0 : index
    %c0_0 = arith.constant 0 : index
    %0 = vector.load %arg1[%c0, %c0_0] : memref<16x64xf32, #tpu.memory_space<vmem>>, vector<16x64xf32>
    %c0_1 = arith.constant 0 : index
    %c0_2 = arith.constant 0 : index
    %1 = vector.load %arg2[%c0_1, %c0_2] : memref<64x128xf32, #tpu.memory_space<vmem>>, vector<64x128xf32>
    %cst = arith.constant dense<0.000000e+00> : vector<16x128xf32>
    %2 = tpu.matmul %0, %1, %cst {dimension_numbers = #tpu.dot_dimension_numbers<[1], [0], [0], [1], [0, 0, 1, 1], [], []>} : vector<16x64xf32>, vector<64x128xf32>, vector<16x128xf32> -> vector<16x128xf32>
    %c0_3 = arith.constant 0 : index
    %c0_4 = arith.constant 0 : index
    %3 = vector.load %arg3[%c0_3, %c0_4] : memref<1x128xf32, #tpu.memory_space<vmem>>, vector<1x128xf32>
    %4 = vector.broadcast %3 : vector<1x128xf32> to vector<16x128xf32>
    %5 = arith.addf %2, %4 : vector<16x128xf32>
    %cst_5 = arith.constant 0.000000e+00 : f32
    %6 = vector.broadcast %cst_5 : f32 to vector<16x128xf32>
    %7 = arith.maximumf %5, %6 : vector<16x128xf32>
    %c0_6 = arith.constant 0 : index
    %c0_7 = arith.constant 0 : index
    %8 = vector.load %arg4[%c0_6, %c0_7] : memref<128x128xf32, #tpu.memory_space<vmem>>, vector<128x128xf32>
    %cst_8 = arith.constant dense<0.000000e+00> : vector<16x128xf32>
    %9 = tpu.matmul %7, %8, %cst_8 {dimension_numbers = #tpu.dot_dimension_numbers<[1], [0], [0], [1], [0, 0, 1, 1], [], []>} : vector<16x128xf32>, vector<128x128xf32>, vector<16x128xf32> -> vector<16x128xf32>
    %c0_9 = arith.constant 0 : index
    %c0_10 = arith.constant 0 : index
    %10 = vector.load %arg5[%c0_9, %c0_10] : memref<1x128xf32, #tpu.memory_space<vmem>>, vector<1x128xf32>
    %11 = vector.broadcast %10 : vector<1x128xf32> to vector<16x128xf32>
    %12 = arith.addf %9, %11 : vector<16x128xf32>
    %cst_11 = arith.constant 0.000000e+00 : f32
    %13 = vector.broadcast %cst_11 : f32 to vector<16x128xf32>
    %14 = arith.maximumf %12, %13 : vector<16x128xf32>
    %c0_12 = arith.constant 0 : index
    %c0_13 = arith.constant 0 : index
    %15 = vector.load %arg6[%c0_12, %c0_13] : memref<16x128xf32, #tpu.memory_space<vmem>>, vector<16x128xf32>
    tpu.vector_store %arg6[%c0_12, %c0_13], %14 {strides = array<i32>} : memref<16x128xf32, #tpu.memory_space<vmem>>, vector<16x128xf32>,
    return
  }
  func.func @transform_0(%arg0: i32) -> (i32, i32) {
    %c0_i32 = arith.constant 0 : i32
    %c0_i32_0 = arith.constant 0 : i32
    return %arg0, %c0_i32 : i32, i32
  }
  func.func @transform_1(%arg0: i32) -> (i32, i32) {
    %c0_i32 = arith.constant 0 : i32
    %c0_i32_0 = arith.constant 0 : i32
    %c0_i32_1 = arith.constant 0 : i32
    return %c0_i32, %c0_i32_0 : i32, i32
  }
  func.func @transform_2(%arg0: i32) -> (i32, i32) {
    %c0_i32 = arith.constant 0 : i32
    %c0_i32_0 = arith.constant 0 : i32
    %c0_i32_1 = arith.constant 0 : i32
    return %c0_i32, %c0_i32_0 : i32, i32
  }
  func.func @transform_3(%arg0: i32) -> (i32, i32) {
    %c0_i32 = arith.constant 0 : i32
    %c0_i32_0 = arith.constant 0 : i32
    %c0_i32_1 = arith.constant 0 : i32
    return %c0_i32, %c0_i32_0 : i32, i32
  }
  func.func @transform_4(%arg0: i32) -> (i32, i32) {
    %c0_i32 = arith.constant 0 : i32
    %c0_i32_0 = arith.constant 0 : i32
    %c0_i32_1 = arith.constant 0 : i32
    return %c0_i32, %c0_i32_0 : i32, i32
  }
  func.func @transform_5(%arg0: i32) -> (i32, i32) {
    %c0_i32 = arith.constant 0 : i32
    %c0_i32_0 = arith.constant 0 : i32
    return %arg0, %c0_i32 : i32, i32
  }
}

module attributes {stable_mosaic.version = 11 : i64} {
  func.func @_mlp1_resident_kernel(%arg0: i32, %arg1: memref<16x64xf32, #tpu.memory_space<vmem>>, %arg2: memref<64x128xf32, #tpu.memory_space<vmem>>, %arg3: memref<1x128xf32, #tpu.memory_space<vmem>>, %arg4: memref<128x128xf32, #tpu.memory_space<vmem>>, %arg5: memref<1x128xf32, #tpu.memory_space<vmem>>, %arg6: memref<16x128xf32, #tpu.memory_space<vmem>>) attributes {dimension_semantics = [#tpu.dimension_semantics<parallel>], iteration_bounds = array<i64: 1>, scalar_prefetch = 0 : i64, scratch_operands = 0 : i64, tpu.core_type = #tpu.core_type<tc>, window_params = [{transform_indices = @transform_0, window_bounds = array<i64: 16, 64>}, {pipeline_mode = #tpu.pipeline_mode<synchronous>, transform_indices = @transform_1, window_bounds = array<i64: 64, 128>}, {pipeline_mode = #tpu.pipeline_mode<synchronous>, transform_indices = @transform_2, window_bounds = array<i64: 1, 128>}, {pipeline_mode = #tpu.pipeline_mode<synchronous>, transform_indices = @transform_3, window_bounds = array<i64: 128, 128>}, {pipeline_mode = #tpu.pipeline_mode<synchronous>, transform_indices = @transform_4, window_bounds = array<i64: 1, 128>}, {transform_indices = @transform_5, window_bounds = array<i64: 16, 128>}]} {
    %c0 = arith.constant 0 : index
    %c0_0 = arith.constant 0 : index
    %0 = vector.load %arg1[%c0, %c0_0] : memref<16x64xf32, #tpu.memory_space<vmem>>, vector<16x64xf32>
    %c0_1 = arith.constant 0 : index
    %c0_2 = arith.constant 0 : index
    %1 = vector.load %arg2[%c0_1, %c0_2] : memref<64x128xf32, #tpu.memory_space<vmem>>, vector<64x128xf32>
    %cst = arith.constant dense<0.000000e+00> : vector<16x128xf32>
    %2 = tpu.matmul %0, %1, %cst {dimension_numbers = #tpu.dot_dimension_numbers<[1], [0], [0], [1], [0, 0, 1, 1], [], []>} : vector<16x64xf32>, vector<64x128xf32>, vector<16x128xf32> -> vector<16x128xf32>
    %c0_3 = arith.constant 0 : index
    %c0_4 = arith.constant 0 : index
    %3 = vector.load %arg3[%c0_3, %c0_4] : memref<1x128xf32, #tpu.memory_space<vmem>>, vector<1x128xf32>
    %4 = vector.broadcast %3 : vector<1x128xf32> to vector<16x128xf32>
    %5 = arith.addf %2, %4 : vector<16x128xf32>
    %cst_5 = arith.constant 0.000000e+00 : f32
    %6 = vector.broadcast %cst_5 : f32 to vector<16x128xf32>
    %7 = arith.maximumf %5, %6 : vector<16x128xf32>
    %c0_6 = arith.constant 0 : index
    %c0_7 = arith.constant 0 : index
    %8 = vector.load %arg4[%c0_6, %c0_7] : memref<128x128xf32, #tpu.memory_space<vmem>>, vector<128x128xf32>
    %cst_8 = arith.constant dense<0.000000e+00> : vector<16x128xf32>
    %9 = tpu.matmul %7, %8, %cst_8 {dimension_numbers = #tpu.dot_dimension_numbers<[1], [0], [0], [1], [0, 0, 1, 1], [], []>} : vector<16x128xf32>, vector<128x128xf32>, vector<16x128xf32> -> vector<16x128xf32>
    %c0_9 = arith.constant 0 : index
    %c0_10 = arith.constant 0 : index
    %10 = vector.load %arg5[%c0_9, %c0_10] : memref<1x128xf32, #tpu.memory_space<vmem>>, vector<1x128xf32>
    %11 = vector.broadcast %10 : vector<1x128xf32> to vector<16x128xf32>
    %12 = arith.addf %9, %11 : vector<16x128xf32>
    %cst_11 = arith.constant 0.000000e+00 : f32
    %13 = vector.broadcast %cst_11 : f32 to vector<16x128xf32>
    %14 = arith.maximumf %12, %13 : vector<16x128xf32>
    %c0_12 = arith.constant 0 : index
    %c0_13 = arith.constant 0 : index
    %15 = vector.load %arg6[%c0_12, %c0_13] : memref<16x128xf32, #tpu.memory_space<vmem>>, vector<16x128xf32>
    tpu.vector_store %arg6[%c0_12, %c0_13], %14 {strides = array<i32>} : memref<16x128xf32, #tpu.memory_space<vmem>>, vector<16x128xf32>,
    return
  }
  func.func @transform_0(%arg0: i32) -> (i32, i32) {
    %c0_i32 = arith.constant 0 : i32
    %c0_i32_0 = arith.constant 0 : i32
    return %arg0, %c0_i32 : i32, i32
  }
  func.func @transform_1(%arg0: i32) -> (i32, i32) {
    %c0_i32 = arith.constant 0 : i32
    %c0_i32_0 = arith.constant 0 : i32
    %c0_i32_1 = arith.constant 0 : i32
    return %c0_i32, %c0_i32_0 : i32, i32
  }
  func.func @transform_2(%arg0: i32) -> (i32, i32) {
    %c0_i32 = arith.constant 0 : i32
    %c0_i32_0 = arith.constant 0 : i32
    %c0_i32_1 = arith.constant 0 : i32
    return %c0_i32, %c0_i32_0 : i32, i32
  }
  func.func @transform_3(%arg0: i32) -> (i32, i32) {
    %c0_i32 = arith.constant 0 : i32
    %c0_i32_0 = arith.constant 0 : i32
    %c0_i32_1 = arith.constant 0 : i32
    return %c0_i32, %c0_i32_0 : i32, i32
  }
  func.func @transform_4(%arg0: i32) -> (i32, i32) {
    %c0_i32 = arith.constant 0 : i32
    %c0_i32_0 = arith.constant 0 : i32
    %c0_i32_1 = arith.constant 0 : i32
    return %c0_i32, %c0_i32_0 : i32, i32
  }
  func.func @transform_5(%arg0: i32) -> (i32, i32) {
    %c0_i32 = arith.constant 0 : i32
    %c0_i32_0 = arith.constant 0 : i32
    return %arg0, %c0_i32 : i32, i32
  }
}

</mosaic_0001>

<bundles_post_ra>
// kernel: tpu_custom_call.1
= control target key start
LH: loop header
LB: loop body
LE: loop exit
PB: predicated region body
PF: predicated region fallthrough
CT: control target
= control target key end

     0   :  { %10 = vsyncpa [#allocation3], 0  ;;  %s529_s0 = inlined_call_operand.hbm [shape: f32[16,64], index: 0, kind: input, shape index: {}]   ;;  %s530_s1 = inlined_call_operand.hbm [shape: f32[64,128], index: 1, kind: input, shape index: {}]   ;;  %s531_s2 = inlined_call_operand.vmem [shape: f32[1,128], index: 2, kind: input, shape index: {}]   ;;  %s532_s3 = inlined_call_operand.hbm [shape: f32[128,128], index: 3, kind: input, shape index: {}]   ;;  %s533_s4 = inlined_call_operand.vmem [shape: f32[1,128], index: 4, kind: input, shape index: {}]   ;;  %s534_s5 = inlined_call_operand.hbm [shape: f32[16,128], index: 5, kind: output, shape index: {}]  }
   0x1   :  { %11 = vsyncpa [#allocation6], 0 }
   0x2   :  { %12 = vsyncpa [#allocation4], 0  ;;  %s461_s18 = smov [#allocation5]   ;;  %s462_s20 = smov [#allocation2]  }
   0x3   :  { %s30_s19 = sshll.u32 %s461_s18, 4  ;;  %s18_s21 = sshll.u32 %s462_s20, 4  ;;  %s31_s19 = int_to_ptr.vmem [resolvable:$true] %s30_s19  ;;  %s19_s21 = int_to_ptr.vmem [resolvable:$true] %s18_s21 }
   0x4   :  { %s383_s22 = scalar_lea.vmem %s31_s19, 1024  ;;  %p388_p1 = scmp.lt.s32.totalorder %s31_s19, %s31_s19 }
   0x5   :  { %p384_p0 = scmp.ne.s32.totalorder %s31_s19, %s383_s22  ;;  %p389_p2 = scmp.lt.s32.totalorder %s383_s22, %s383_s22 }
   0x7   :  { %p390_p3 = por %p389_p2, %p388_p1 }
   0x9   :  { %p391_p4 = pnand %p390_p3, %p384_p0 }
   0xb   :  { %394 = shalt.err (!%p391_p4)
}
   0xc   :  { %s463_s23 = smov 128   ;;  %s464_s24 = smov 8  }
   0xd   :  { %36 = dma.hbm_to_vmem [thread:$0]  %s530_s1, 1024, %s31_s19, [#allocation6], %s463_s23, %s463_s23, %s464_s24  }
   0xe   :  { %s403_s27 = scalar_lea.vmem %s19_s21, 256  ;;  %p408_p6 = scmp.lt.s32.totalorder %s19_s21, %s19_s21 }
   0xf   :  { %p404_p5 = scmp.ne.s32.totalorder %s19_s21, %s403_s27  ;;  %p409_p7 = scmp.lt.s32.totalorder %s403_s27, %s403_s27 }
  0x11   :  { %p410_p8 = por %p409_p7, %p408_p6 }
  0x13   :  { %p411_p9 = pnand %p410_p8, %p404_p5 }
  0x15   :  { %414 = shalt.err (!%p411_p9)
}
  0x16   :  { %24 = dma.hbm_to_vmem [thread:$0]  %s529_s0, 256, %s19_s21, [#allocation3], %s463_s23, %s463_s23, %s464_s24  }
  0x17   :  { %s465_s30 = smov [#allocation7]  }
  0x18   :  { %s44_s6 = sshll.u32 %s465_s30, 4  ;;  %s45_s6 = int_to_ptr.vmem [resolvable:$true] %s44_s6 }
  0x19   :  { %s423_s7 = scalar_lea.vmem %s45_s6, 2048  ;;  %p428_p11 = scmp.lt.s32.totalorder %s45_s6, %s45_s6 }
  0x1a   :  { %p424_p10 = scmp.ne.s32.totalorder %s45_s6, %s423_s7  ;;  %p429_p12 = scmp.lt.s32.totalorder %s423_s7, %s423_s7 }
  0x1c   :  { %p430_p13 = por %p429_p12, %p428_p11 }
  0x1e   :  { %p431_p0 = pnand %p430_p13, %p424_p10 }
  0x20   :  { %434 = shalt.err (!%p431_p0)
}
  0x21   :  { %50 = dma.hbm_to_vmem [thread:$0]  %s532_s3, 2048, %s45_s6, [#allocation6], %s463_s23, %s463_s23, %s464_s24  }
  0x22   :  { %455 = dma.done.wait [#allocation3], 256  }
  0x23   :  { %456 = vsyncadd [#allocation3], 4294967040 }
  0x24   :  { %457 = dma.done.wait [#allocation6], 3072  }
  0x25   :  { %458 = vsyncadd [#allocation6], 4294964224  ;;  %v71_v0 = vld [vmem:[#allocation5 + $0x38] sm:$0xff]  ;;  %v70_v1 = vld [vmem:[#allocation5 + $0x30] sm:$0xff]  ;;  %vm79_vm0 = vcmask 523264   ;;  %s466_s11 = smov [#allocation8]  }
  0x26   :  { %315 = vmatprep.subr.mxu0 %v71_v0  ;;  %v69_v2 = vld [vmem:[#allocation5 + $0x28] sm:$0xff]  ;;  %v62_v3 = vld [vmem:[#allocation2] sm:$0xff]  ;;  %v178_v4 = vld [vmem:[#allocation7 + $0x78] sm:$0xff]  ;;  %s270_s12 = sshll.u32 %s466_s11, 4  ;;  %s271_s12 = int_to_ptr.vmem [resolvable:$true] %s270_s12 }
  0x27   :  { %316 = vmatpush3.msra.mxu0 %v71_v0  ;;  %331 = vmatprep.mubr.msk.f32.mxu0 %vm79_vm0, %v62_v3  ;;  %v177_v5 = vld [vmem:[#allocation7 + $0x70] sm:$0xff]  ;;  %v68_v6 = vld [vmem:[#allocation5 + $0x20] sm:$0xff]  ;;  %v176_v7 = vld [vmem:[#allocation7 + $0x68] sm:$0xff]  ;;  %p440_p2 = scmp.lt.s32.totalorder %s271_s12, %s271_s12 }
  0x28   :  { %317 = vmatprep.subr.mxu0 %v70_v1  ;;  %334 = vmatprep.subr.mxu1 %v178_v4  ;;  %v67_v8 = vld [vmem:[#allocation5 + $0x18] sm:$0xff]  ;;  %v175_v9 = vld [vmem:[#allocation7 + $0x60] sm:$0xff]  ;;  %v66_v10 = vld [vmem:[#allocation5 + $0x10] sm:$0xff] }
  0x29   :  { %318 = vmatpush3.msra.mxu0 %v70_v1  ;;  %335 = vmatpush3.msra.mxu1 %v178_v4  ;;  %v174_v11 = vld [vmem:[#allocation7 + $0x58] sm:$0xff]  ;;  %v65_v12 = vld [vmem:[#allocation5 + $0x8] sm:$0xff]  ;;  %v173_v13 = vld [vmem:[#allocation7 + $0x50] sm:$0xff] }
  0x2a   :  { %319 = vmatprep.subr.mxu0 %v69_v2  ;;  %336 = vmatprep.subr.mxu1 %v177_v5  ;;  %v64_v14 = vld [vmem:[#allocation5] sm:$0xff]  ;;  %v172_v15 = vld [vmem:[#allocation7 + $0x48] sm:$0xff]  ;;  %v63_v16 = vld [vmem:[#allocation2 + $0x8] sm:$0xff] }
  0x2b   :  { %320 = vmatpush3.msra.mxu0 %v69_v2  ;;  %337 = vmatpush3.msra.mxu1 %v177_v5  ;;  %v171_v17 = vld [vmem:[#allocation7 + $0x40] sm:$0xff]  ;;  %v170_v18 = vld [vmem:[#allocation7 + $0x38] sm:$0xff]  ;;  %v169_v19 = vld [vmem:[#allocation7 + $0x30] sm:$0xff] }
  0x2c   :  { %321 = vmatprep.subr.mxu0 %v68_v6  ;;  %338 = vmatprep.subr.mxu1 %v176_v7  ;;  %v168_v20 = vld [vmem:[#allocation7 + $0x28] sm:$0xff]  ;;  %v167_v21 = vld [vmem:[#allocation7 + $0x20] sm:$0xff]  ;;  %v166_v22 = vld [vmem:[#allocation7 + $0x18] sm:$0xff] }
  0x2d   :  { %322 = vmatpush3.msra.mxu0 %v68_v6  ;;  %339 = vmatpush3.msra.mxu1 %v176_v7  ;;  %v165_v23 = vld [vmem:[#allocation7 + $0x10] sm:$0xff]  ;;  %v164_v24 = vld [vmem:[#allocation7 + $0x8] sm:$0xff]  ;;  %v163_v25 = vld [vmem:[#allocation7] sm:$0xff] }
  0x2e   :  { %323 = vmatprep.subr.mxu0 %v67_v8  ;;  %340 = vmatprep.subr.mxu1 %v175_v9  ;;  %v283_v26 = vld [vmem:[%s531_s2] ss:$0 sm:$0xff]  ;;  %s435_s2 = scalar_lea.vmem %s271_s12, 256 }
  0x2f   :  { %324 = vmatpush3.msra.mxu0 %v67_v8  ;;  %341 = vmatpush3.msra.mxu1 %v175_v9  ;;  %v286_v33 = vld [vmem:[%s533_s4] ss:$0 sm:$0xff]  ;;  %p436_p1 = scmp.ne.s32.totalorder %s271_s12, %s435_s2  ;;  %p441_p3 = scmp.lt.s32.totalorder %s435_s2, %s435_s2 }
  0x30   :  { %325 = vmatprep.subr.mxu0 %v66_v10  ;;  %342 = vmatprep.subr.mxu1 %v174_v11 }
  0x31   :  { %326 = vmatpush3.msra.mxu0 %v66_v10  ;;  %343 = vmatpush3.msra.mxu1 %v174_v11  ;;  %p442_p4 = por %p441_p3, %p440_p2 }
  0x32   :  { %327 = vmatprep.subr.mxu0 %v65_v12  ;;  %344 = vmatprep.subr.mxu1 %v173_v13 }
  0x33   :  { %328 = vmatpush3.msra.mxu0 %v65_v12  ;;  %345 = vmatpush3.msra.mxu1 %v173_v13  ;;  %p443_p5 = pnand %p442_p4, %p436_p1 }
  0x34   :  { %329 = vmatprep.subr.mxu0 %v64_v14  ;;  %346 = vmatprep.subr.mxu1 %v172_v15 }
  0x35   :  { %330 = vmatpush3.msra.mxu0 %v64_v14  ;;  %347 = vmatpush3.msra.mxu1 %v172_v15 }
  0x36   :  { %332 = vmatmul.mubr.msk.f32.vlgmr.msra.gmra.mxu0 %vm79_vm0, %v63_v16  ;;  %348 = vmatprep.subr.mxu1 %v171_v17 }
  0x37   :  { %349 = vmatpush3.msra.mxu1 %v171_v17 }
  0x38   :  { %350 = vmatprep.subr.mxu1 %v170_v18 }
  0x39   :  { %351 = vmatpush3.msra.mxu1 %v170_v18 }
  0x3a   :  { %352 = vmatprep.subr.mxu1 %v169_v19 }
  0x3b   :  { %353 = vmatpush3.msra.mxu1 %v169_v19 }
  0x3c   :  { %354 = vmatprep.subr.mxu1 %v168_v20 }
  0x3d   :  { %355 = vmatpush3.msra.mxu1 %v168_v20 }
  0x3e   :  { %356 = vmatprep.subr.mxu1 %v167_v21 }
  0x3f   :  { %357 = vmatpush3.msra.mxu1 %v167_v21 }
  0x40   :  { %358 = vmatprep.subr.mxu1 %v166_v22 }
  0x41   :  { %359 = vmatpush3.msra.mxu1 %v166_v22 }
  0x42   :  { %360 = vmatprep.subr.mxu1 %v165_v23 }
  0x43   :  { %361 = vmatpush3.msra.mxu1 %v165_v23 }
  0x44   :  { %362 = vmatprep.subr.mxu1 %v164_v24 }
  0x45   :  { %363 = vmatpush3.msra.mxu1 %v164_v24 }
  0x46   :  { %364 = vmatprep.subr.mxu1 %v163_v25 }
  0x47   :  { %365 = vmatpush3.msra.mxu1 %v163_v25 }
  0xf6   :  { %v333_v27 = vpop.f32.mrf.mxu0 }
  0xf7   :  { %v158_v28 = vadd.f32 %v333_v27, %v283_v26 }
  0xf8   :  { %v152_v29 = vpop.f32.mrf.mxu0 }
  0xf9   :  { %v153_v30 = vadd.f32 %v283_v26, %v152_v29  ;;  %v162_v32 = vmax.f32 %v158_v28, 0.0 }
  0xfb   :  { %v161_v31 = vmax.f32 %v153_v30, 0.0 }
  0xfd   :  { %366 = vmatprep.mubr.f32.mxu1 %v161_v31 }
  0xfe   :  { %367 = vmatmul.mubr.f32.vlgmr.msra.gmra.mxu1 %v162_v32 }
 0x1be   :  { %v368_v34 = vpop.f32.mrf.mxu1 }
 0x1bf   :  { %v258_v35 = vadd.f32 %v368_v34, %v286_v33 }
 0x1c0   :  { %v252_v36 = vpop.f32.mrf.mxu1 }
 0x1c1   :  { %v262_v37 = vmax.f32 %v258_v35, 0.0  ;;  %v253_v38 = vadd.f32 %v286_v33, %v252_v36 }
 0x1c3   :  { %264 = vst [vmem:[#allocation8 + $0x8] sm:$0xff] %v262_v37  ;;  %v261_v39 = vmax.f32 %v253_v38, 0.0 }
 0x1c5   :  { %263 = vst [vmem:[#allocation8] sm:$0xff] %v261_v39 }
 0x1c6   :  { %446 = shalt.err (!%p443_p5)
}
 0x1c7   :  { %276 = dma.vmem_to_hbm [thread:$0]  %s271_s12, 256, %s534_s5, [#allocation4], %s463_s23, %s463_s23, %s464_s24  }
 0x1c8   :  { %459 = dma.done.wait [#allocation4], 256  }
 0x1c9   :  { %460 = vsyncadd [#allocation4], 4294967040 }
 0x1ca   :  { %280 = vsyncpa [#allocation3], 1 }
 0x1cb   :  { %281 = vsyncpa [#allocation6], 1 }
 0x1cc   :  { %282 = vsyncpa [#allocation4], 1 }

// kernel: tpu_custom_call.1
= control target key start
LH: loop header
LB: loop body
LE: loop exit
PB: predicated region body
PF: predicated region fallthrough
CT: control target
= control target key end

     0   :  { %10 = vsyncpa [#allocation3], 0  ;;  %s529_s0 = inlined_call_operand.hbm [shape: f32[16,64], index: 0, kind: input, shape index: {}]   ;;  %s530_s1 = inlined_call_operand.hbm [shape: f32[64,128], index: 1, kind: input, shape index: {}]   ;;  %s531_s2 = inlined_call_operand.vmem [shape: f32[1,128], index: 2, kind: input, shape index: {}]   ;;  %s532_s3 = inlined_call_operand.hbm [shape: f32[128,128], index: 3, kind: input, shape index: {}]   ;;  %s533_s4 = inlined_call_operand.vmem [shape: f32[1,128], index: 4, kind: input, shape index: {}]   ;;  %s534_s5 = inlined_call_operand.hbm [shape: f32[16,128], index: 5, kind: output, shape index: {}]  }
   0x1   :  { %11 = vsyncpa [#allocation6], 0 }
   0x2   :  { %12 = vsyncpa [#allocation4], 0  ;;  %s461_s18 = smov [#allocation5]   ;;  %s462_s20 = smov [#allocation2]  }
   0x3   :  { %s30_s19 = sshll.u32 %s461_s18, 4  ;;  %s18_s21 = sshll.u32 %s462_s20, 4  ;;  %s31_s19 = int_to_ptr.vmem [resolvable:$true] %s30_s19  ;;  %s19_s21 = int_to_ptr.vmem [resolvable:$true] %s18_s21 }
   0x4   :  { %s383_s22 = scalar_lea.vmem %s31_s19, 1024  ;;  %p388_p1 = scmp.lt.s32.totalorder %s31_s19, %s31_s19 }
   0x5   :  { %p384_p0 = scmp.ne.s32.totalorder %s31_s19, %s383_s22  ;;  %p389_p2 = scmp.lt.s32.totalorder %s383_s22, %s383_s22 }
   0x7   :  { %p390_p3 = por %p389_p2, %p388_p1 }
   0x9   :  { %p391_p4 = pnand %p390_p3, %p384_p0 }
   0xb   :  { %394 = shalt.err (!%p391_p4)
}
   0xc   :  { %s463_s23 = smov 128   ;;  %s464_s24 = smov 8  }
   0xd   :  { %36 = dma.hbm_to_vmem [thread:$0]  %s530_s1, 1024, %s31_s19, [#allocation6], %s463_s23, %s463_s23, %s464_s24  }
   0xe   :  { %s403_s27 = scalar_lea.vmem %s19_s21, 256  ;;  %p408_p6 = scmp.lt.s32.totalorder %s19_s21, %s19_s21 }
   0xf   :  { %p404_p5 = scmp.ne.s32.totalorder %s19_s21, %s403_s27  ;;  %p409_p7 = scmp.lt.s32.totalorder %s403_s27, %s403_s27 }
  0x11   :  { %p410_p8 = por %p409_p7, %p408_p6 }
  0x13   :  { %p411_p9 = pnand %p410_p8, %p404_p5 }
  0x15   :  { %414 = shalt.err (!%p411_p9)
}
  0x16   :  { %24 = dma.hbm_to_vmem [thread:$0]  %s529_s0, 256, %s19_s21, [#allocation3], %s463_s23, %s463_s23, %s464_s24  }
  0x17   :  { %s465_s30 = smov [#allocation7]  }
  0x18   :  { %s44_s6 = sshll.u32 %s465_s30, 4  ;;  %s45_s6 = int_to_ptr.vmem [resolvable:$true] %s44_s6 }
  0x19   :  { %s423_s7 = scalar_lea.vmem %s45_s6, 2048  ;;  %p428_p11 = scmp.lt.s32.totalorder %s45_s6, %s45_s6 }
  0x1a   :  { %p424_p10 = scmp.ne.s32.totalorder %s45_s6, %s423_s7  ;;  %p429_p12 = scmp.lt.s32.totalorder %s423_s7, %s423_s7 }
  0x1c   :  { %p430_p13 = por %p429_p12, %p428_p11 }
  0x1e   :  { %p431_p0 = pnand %p430_p13, %p424_p10 }
  0x20   :  { %434 = shalt.err (!%p431_p0)
}
  0x21   :  { %50 = dma.hbm_to_vmem [thread:$0]  %s532_s3, 2048, %s45_s6, [#allocation6], %s463_s23, %s463_s23, %s464_s24  }
  0x22   :  { %455 = dma.done.wait [#allocation3], 256  }
  0x23   :  { %456 = vsyncadd [#allocation3], 4294967040 }
  0x24   :  { %457 = dma.done.wait [#allocation6], 3072  }
  0x25   :  { %458 = vsyncadd [#allocation6], 4294964224  ;;  %v71_v0 = vld [vmem:[#allocation5 + $0x38] sm:$0xff]  ;;  %v70_v1 = vld [vmem:[#allocation5 + $0x30] sm:$0xff]  ;;  %vm79_vm0 = vcmask 523264   ;;  %s466_s11 = smov [#allocation8]  }
  0x26   :  { %315 = vmatprep.subr.mxu0 %v71_v0  ;;  %v69_v2 = vld [vmem:[#allocation5 + $0x28] sm:$0xff]  ;;  %v62_v3 = vld [vmem:[#allocation2] sm:$0xff]  ;;  %v178_v4 = vld [vmem:[#allocation7 + $0x78] sm:$0xff]  ;;  %s270_s12 = sshll.u32 %s466_s11, 4  ;;  %s271_s12 = int_to_ptr.vmem [resolvable:$true] %s270_s12 }
  0x27   :  { %316 = vmatpush3.msra.mxu0 %v71_v0  ;;  %331 = vmatprep.mubr.msk.f32.mxu0 %vm79_vm0, %v62_v3  ;;  %v177_v5 = vld [vmem:[#allocation7 + $0x70] sm:$0xff]  ;;  %v68_v6 = vld [vmem:[#allocation5 + $0x20] sm:$0xff]  ;;  %v176_v7 = vld [vmem:[#allocation7 + $0x68] sm:$0xff]  ;;  %p440_p2 = scmp.lt.s32.totalorder %s271_s12, %s271_s12 }
  0x28   :  { %317 = vmatprep.subr.mxu0 %v70_v1  ;;  %334 = vmatprep.subr.mxu1 %v178_v4  ;;  %v67_v8 = vld [vmem:[#allocation5 + $0x18] sm:$0xff]  ;;  %v175_v9 = vld [vmem:[#allocation7 + $0x60] sm:$0xff]  ;;  %v66_v10 = vld [vmem:[#allocation5 + $0x10] sm:$0xff] }
  0x29   :  { %318 = vmatpush3.msra.mxu0 %v70_v1  ;;  %335 = vmatpush3.msra.mxu1 %v178_v4  ;;  %v174_v11 = vld [vmem:[#allocation7 + $0x58] sm:$0xff]  ;;  %v65_v12 = vld [vmem:[#allocation5 + $0x8] sm:$0xff]  ;;  %v173_v13 = vld [vmem:[#allocation7 + $0x50] sm:$0xff] }
  0x2a   :  { %319 = vmatprep.subr.mxu0 %v69_v2  ;;  %336 = vmatprep.subr.mxu1 %v177_v5  ;;  %v64_v14 = vld [vmem:[#allocation5] sm:$0xff]  ;;  %v172_v15 = vld [vmem:[#allocation7 + $0x48] sm:$0xff]  ;;  %v63_v16 = vld [vmem:[#allocation2 + $0x8] sm:$0xff] }
  0x2b   :  { %320 = vmatpush3.msra.mxu0 %v69_v2  ;;  %337 = vmatpush3.msra.mxu1 %v177_v5  ;;  %v171_v17 = vld [vmem:[#allocation7 + $0x40] sm:$0xff]  ;;  %v170_v18 = vld [vmem:[#allocation7 + $0x38] sm:$0xff]  ;;  %v169_v19 = vld [vmem:[#allocation7 + $0x30] sm:$0xff] }
  0x2c   :  { %321 = vmatprep.subr.mxu0 %v68_v6  ;;  %338 = vmatprep.subr.mxu1 %v176_v7  ;;  %v168_v20 = vld [vmem:[#allocation7 + $0x28] sm:$0xff]  ;;  %v167_v21 = vld [vmem:[#allocation7 + $0x20] sm:$0xff]  ;;  %v166_v22 = vld [vmem:[#allocation7 + $0x18] sm:$0xff] }
  0x2d   :  { %322 = vmatpush3.msra.mxu0 %v68_v6  ;;  %339 = vmatpush3.msra.mxu1 %v176_v7  ;;  %v165_v23 = vld [vmem:[#allocation7 + $0x10] sm:$0xff]  ;;  %v164_v24 = vld [vmem:[#allocation7 + $0x8] sm:$0xff]  ;;  %v163_v25 = vld [vmem:[#allocation7] sm:$0xff] }
  0x2e   :  { %323 = vmatprep.subr.mxu0 %v67_v8  ;;  %340 = vmatprep.subr.mxu1 %v175_v9  ;;  %v283_v26 = vld [vmem:[%s531_s2] ss:$0 sm:$0xff]  ;;  %s435_s2 = scalar_lea.vmem %s271_s12, 256 }
  0x2f   :  { %324 = vmatpush3.msra.mxu0 %v67_v8  ;;  %341 = vmatpush3.msra.mxu1 %v175_v9  ;;  %v286_v33 = vld [vmem:[%s533_s4] ss:$0 sm:$0xff]  ;;  %p436_p1 = scmp.ne.s32.totalorder %s271_s12, %s435_s2  ;;  %p441_p3 = scmp.lt.s32.totalorder %s435_s2, %s435_s2 }
  0x30   :  { %325 = vmatprep.subr.mxu0 %v66_v10  ;;  %342 = vmatprep.subr.mxu1 %v174_v11 }
  0x31   :  { %326 = vmatpush3.msra.mxu0 %v66_v10  ;;  %343 = vmatpush3.msra.mxu1 %v174_v11  ;;  %p442_p4 = por %p441_p3, %p440_p2 }
  0x32   :  { %327 = vmatprep.subr.mxu0 %v65_v12  ;;  %344 = vmatprep.subr.mxu1 %v173_v13 }
  0x33   :  { %328 = vmatpush3.msra.mxu0 %v65_v12  ;;  %345 = vmatpush3.msra.mxu1 %v173_v13  ;;  %p443_p5 = pnand %p442_p4, %p436_p1 }
  0x34   :  { %329 = vmatprep.subr.mxu0 %v64_v14  ;;  %346 = vmatprep.subr.mxu1 %v172_v15 }
  0x35   :  { %330 = vmatpush3.msra.mxu0 %v64_v14  ;;  %347 = vmatpush3.msra.mxu1 %v172_v15 }
  0x36   :  { %332 = vmatmul.mubr.msk.f32.vlgmr.msra.gmra.mxu0 %vm79_vm0, %v63_v16  ;;  %348 = vmatprep.subr.mxu1 %v171_v17 }
  0x37   :  { %349 = vmatpush3.msra.mxu1 %v171_v17 }
  0x38   :  { %350 = vmatprep.subr.mxu1 %v170_v18 }
  0x39   :  { %351 = vmatpush3.msra.mxu1 %v170_v18 }
  0x3a   :  { %352 = vmatprep.subr.mxu1 %v169_v19 }
  0x3b   :  { %353 = vmatpush3.msra.mxu1 %v169_v19 }
  0x3c   :  { %354 = vmatprep.subr.mxu1 %v168_v20 }
  0x3d   :  { %355 = vmatpush3.msra.mxu1 %v168_v20 }
  0x3e   :  { %356 = vmatprep.subr.mxu1 %v167_v21 }
  0x3f   :  { %357 = vmatpush3.msra.mxu1 %v167_v21 }
  0x40   :  { %358 = vmatprep.subr.mxu1 %v166_v22 }
  0x41   :  { %359 = vmatpush3.msra.mxu1 %v166_v22 }
  0x42   :  { %360 = vmatprep.subr.mxu1 %v165_v23 }
  0x43   :  { %361 = vmatpush3.msra.mxu1 %v165_v23 }
  0x44   :  { %362 = vmatprep.subr.mxu1 %v164_v24 }
  0x45   :  { %363 = vmatpush3.msra.mxu1 %v164_v24 }
  0x46   :  { %364 = vmatprep.subr.mxu1 %v163_v25 }
  0x47   :  { %365 = vmatpush3.msra.mxu1 %v163_v25 }
  0xf6   :  { %v333_v27 = vpop.f32.mrf.mxu0 }
  0xf7   :  { %v158_v28 = vadd.f32 %v333_v27, %v283_v26 }
  0xf8   :  { %v152_v29 = vpop.f32.mrf.mxu0 }
  0xf9   :  { %v153_v30 = vadd.f32 %v283_v26, %v152_v29  ;;  %v162_v32 = vmax.f32 %v158_v28, 0.0 }
  0xfb   :  { %v161_v31 = vmax.f32 %v153_v30, 0.0 }
  0xfd   :  { %366 = vmatprep.mubr.f32.mxu1 %v161_v31 }
  0xfe   :  { %367 = vmatmul.mubr.f32.vlgmr.msra.gmra.mxu1 %v162_v32 }
 0x1be   :  { %v368_v34 = vpop.f32.mrf.mxu1 }
 0x1bf   :  { %v258_v35 = vadd.f32 %v368_v34, %v286_v33 }
 0x1c0   :  { %v252_v36 = vpop.f32.mrf.mxu1 }
 0x1c1   :  { %v262_v37 = vmax.f32 %v258_v35, 0.0  ;;  %v253_v38 = vadd.f32 %v286_v33, %v252_v36 }
 0x1c3   :  { %264 = vst [vmem:[#allocation8 + $0x8] sm:$0xff] %v262_v37  ;;  %v261_v39 = vmax.f32 %v253_v38, 0.0 }
 0x1c5   :  { %263 = vst [vmem:[#allocation8] sm:$0xff] %v261_v39 }
 0x1c6   :  { %446 = shalt.err (!%p443_p5)
}
 0x1c7   :  { %276 = dma.vmem_to_hbm [thread:$0]  %s271_s12, 256, %s534_s5, [#allocation4], %s463_s23, %s463_s23, %s464_s24  }
 0x1c8   :  { %459 = dma.done.wait [#allocation4], 256  }
 0x1c9   :  { %460 = vsyncadd [#allocation4], 4294967040 }
 0x1ca   :  { %280 = vsyncpa [#allocation3], 1 }
 0x1cb   :  { %281 = vsyncpa [#allocation6], 1 }
 0x1cc   :  { %282 = vsyncpa [#allocation4], 1 }

</bundles_post_ra>
